<compile_context>
chip_gen: v5e
topology: v5e:2x2
jax: 0.10.0
libtpu: 0.0.40
codegen_flags: <defaults>
</compile_context>

<pallas_src>
import functools

import jax
import jax.numpy as jnp
from jax import lax
from jax.experimental import pallas as pl
from jax.experimental.pallas import tpu as pltpu

NEG = -1e30                      # masked frames never win the max
_TARGET_BLOCK_BYTES = 8 * 1024 * 1024   # ~8 MiB framewise block per buffer


def _cdiv(a, b):
    return -(-a // b)


def _focal_elem(x, t, *, alpha, gamma, pos_weight):
    """Elementwise focal BCE-with-logits (f32 in, f32 out)."""
    ax = jnp.abs(x)
    e = jnp.exp(-ax)                              # exp(-|x|), reused below
    sp_pos = jnp.maximum(x, 0.0) + jnp.log1p(e)   # softplus(x), stable
    r = pl.reciprocal(1.0 + e)                    # exact (approx=False)
    p = jnp.where(x >= 0, r, e * r)               # sigmoid(x) from same exp

    if pos_weight is None:
        # pw=1: t*softplus(-x) + (1-t)*softplus(x) == softplus(x) - t*x
        bce = sp_pos - t * x
    else:
        sp_neg = sp_pos - x                       # softplus(-x)
        bce = pos_weight * t * sp_neg + (1.0 - t) * sp_pos

    q = 1.0 - p
    if float(gamma) == 2.0:
        p_g = p * p
        q_g = q * q
    elif float(gamma).is_integer():
        p_g = lax.integer_pow(p, int(gamma))
        q_g = lax.integer_pow(q, int(gamma))
    else:
        p_g = p ** gamma
        q_g = q ** gamma

    return (t * alpha * q_g + (1.0 - t) * p_g) * bce


def _focal2way_kernel(x1_ref, t_ref, fw_ref, out_ref, m_ref, acc_ref, *,
                      alpha, gamma, pos_weight, w0, w1,
                      true_b, true_t, tb, tt, need_b_mask, need_t_mask):
    i = pl.program_id(0)
    k = pl.program_id(1)
    nk = pl.num_programs(1)

    # Frame-axis mask for the (possibly ragged) last T tile; OOB reads are
    # garbage, so force them to a huge negative before the max.
    fw = fw_ref[...]
    if need_t_mask:
        frame = k * tt + lax.broadcasted_iota(jnp.int32, fw.shape, 1)
        fw = jnp.where(frame < true_t, fw, NEG)
    tile_max = jnp.max(fw, axis=1)                # (tb, C), native dtype

    def row_masked(loss):
        # Zero contributions of rows >= B (ragged last B tile). jnp.where
        # selects 0 even if the masked value is NaN/Inf from garbage reads.
        if not need_b_mask:
            return loss
        rows = i * tb + lax.broadcasted_iota(jnp.int32, loss.shape, 0)
        return jnp.where(rows < true_b, loss, 0.0)

    @pl.when(k == 0)
    def _():
        m_ref[...] = tile_max
        t = t_ref[...].astype(jnp.float32)
        l1 = _focal_elem(x1_ref[...].astype(jnp.float32), t,
                         alpha=alpha, gamma=gamma, pos_weight=pos_weight)
        acc_ref[...] = w0 * row_masked(l1)

    @pl.when(k > 0)
    def _():
        m_ref[...] = jnp.maximum(m_ref[...], tile_max)

    # Frame max complete for this B tile: add the aux focal term, reduce to a
    # scalar partial, and write this tile's private output block (exactly once).
    @pl.when(k == nk - 1)
    def _():
        t = t_ref[...].astype(jnp.float32)
        l2 = _focal_elem(m_ref[...].astype(jnp.float32), t,
                         alpha=alpha, gamma=gamma, pos_weight=pos_weight)
        partial = jnp.sum(acc_ref[...] + w1 * row_masked(l2))
        out_ref[...] = jnp.broadcast_to(partial, out_ref.shape)


def _choose_tiles(B, T, C, itemsize, max_block_bytes):
    """Pick (tb, tt) so the framewise block is ~max_block_bytes.

    Constraints: the (tb, C) clip block needs tb % 8 == 0 or tb == B; the
    (tb, tt, C) framewise block needs tt % 8 == 0 or tt == T (C is always the
    full last dim, which is always legal).
    """
    cap = (max_block_bytes // max(1, 8 * C * itemsize)) // 8 * 8
    cap = max(8, min(64, cap))
    tb = B if B <= cap else cap

    row_bytes = tb * C * itemsize
    tt_budget = max(8, (max_block_bytes // max(1, row_bytes)) // 8 * 8)
    tt = T if T <= tt_budget else tt_budget
    return tb, tt


def bce_focal_2way_loss(inputs, target, weights=(1.0, 1.0), alpha=0.25,
                        gamma=2.0, pos_weight=None,
                        max_block_bytes=_TARGET_BLOCK_BYTES):
    """Pallas implementation of BCEFocal2WayLoss.forward; returns a scalar."""
    logit = inputs["logit"]                    # (B, C)
    framewise = inputs["framewise_logit"]      # (B, T, C)
    B, C = logit.shape
    Bf, T, Cf = framewise.shape
    assert (Bf, Cf) == (B, C)

    # Match the module: promote integer class targets to one-hot.
    if target.shape != logit.shape:
        target = jax.nn.one_hot(target, C, dtype=jnp.float32)
    target = target.astype(jnp.float32)

    fw_itemsize = jnp.dtype(framewise.dtype).itemsize
    tb, tt = _choose_tiles(B, T, C, fw_itemsize, max_block_bytes)
    nb = _cdiv(B, tb)
    nt = _cdiv(T, tt)
    need_b_mask = (nb * tb != B)
    need_t_mask = (nt * tt != T)

    kernel = functools.partial(
        _focal2way_kernel,
        alpha=float(alpha), gamma=float(gamma),
        pos_weight=None if pos_weight is None else float(pos_weight),
        w0=float(weights[0]), w1=float(weights[1]),
        true_b=B, true_t=T, tb=tb, tt=tt,
        need_b_mask=need_b_mask, need_t_mask=need_t_mask)

    n_fw = B * T * C
    n_cl = B * C
    cost = pl.CostEstimate(
        flops=int(n_fw + 60 * n_cl),
        transcendentals=int(4 * n_cl),
        bytes_accessed=int(n_fw * fw_itemsize
                           + n_cl * (jnp.dtype(logit.dtype).itemsize + 4)
                           + nb * 8 * 128 * 4),
    )

    partials = pl.pallas_call(
        kernel,
        out_shape=jax.ShapeDtypeStruct((nb, 8, 128), jnp.float32),
        grid_spec=pltpu.PrefetchScalarGridSpec(
            num_scalar_prefetch=0,
            grid=(nb, nt),
            in_specs=[
                pl.BlockSpec((tb, C), lambda i, k: (i, 0)),        # clip logit
                pl.BlockSpec((tb, C), lambda i, k: (i, 0)),        # target
                pl.BlockSpec((tb, tt, C), lambda i, k: (i, k, 0)),  # framewise
            ],
            out_specs=pl.BlockSpec((1, 8, 128), lambda i, k: (i, 0, 0)),
            scratch_shapes=[
                pltpu.VMEM((tb, C), framewise.dtype),   # running frame-max
                pltpu.VMEM((tb, C), jnp.float32),       # w0*l1 per-tile stash
            ],
        ),
        compiler_params=pltpu.CompilerParams(
            dimension_semantics=("parallel", "arbitrary"),
            vmem_limit_bytes=48 * 1024 * 1024),
        cost_estimate=cost,
    )(logit, target, framewise)

    # Per-B-tile partial weighted sums -> final mean (both focal means share
    # the same B*C element count, so one division suffices).
    return jnp.sum(partials[:, 0, 0]) / jnp.float32(B * C)


def _reference(inputs, target, weights=(1.0, 1.0),
               alpha=0.25, gamma=2.0, pos_weight=None):
    """Pure-JAX reference mirroring the PyTorch module."""
    pw = 1.0 if pos_weight is None else float(pos_weight)

    def focal(x, t):
        x = x.astype(jnp.float32)
        t = t.astype(jnp.float32)
        sp = lambda z: jnp.maximum(z, 0.0) + jnp.log1p(jnp.exp(-jnp.abs(z)))
        bce = pw * t * sp(-x) + (1.0 - t) * sp(x)
        p = jax.nn.sigmoid(x)
        loss = t * alpha * (1.0 - p) ** gamma * bce + (1.0 - t) * p ** gamma * bce
        return jnp.mean(loss)

    x1 = inputs["logit"]
    x2 = jnp.max(inputs["framewise_logit"], axis=1)
    t = target.astype(jnp.float32)
    return weights[0] * focal(x1, t) + weights[1] * focal(x2, t)


if __name__ == "__main__":
    key = jax.random.PRNGKey(0)
    k1, k2, k3, k4, k5, k6 = jax.random.split(key, 6)

    # Test 1: small shapes consistent with the module (batch=2, frames=8,
    # classes=32) -> single tile, no masking path.
    B, T, C = 2, 8, 32
    inputs = {
        "logit": jax.random.normal(k1, (B, C), dtype=jnp.float32) * 2.0,
        "framewise_logit": jax.random.normal(k2, (B, T, C), dtype=jnp.float32) * 2.0,
    }
    target = (jax.random.uniform(k3, (B, C)) > 0.5).astype(jnp.float32)

    loss = bce_focal_2way_loss(inputs, target)
    jax.block_until_ready(loss)
    ref = _reference(inputs, target)
    assert jnp.allclose(loss, ref, rtol=1e-5, atol=1e-6), (loss, ref)

    # Test 2: ragged B/T and a tiny block budget to exercise the tiled grid,
    # the running-max reduction and the in-kernel masks (no wrapper padding).
    B2, T2, C2 = 11, 21, 40
    inputs2 = {
        "logit": jax.random.normal(k4, (B2, C2), dtype=jnp.float32) * 2.0,
        "framewise_logit": jax.random.normal(k5, (B2, T2, C2), dtype=jnp.float32) * 2.0,
    }
    target2 = (jax.random.uniform(k6, (B2, C2)) > 0.5).astype(jnp.float32)

    loss2 = bce_focal_2way_loss(inputs2, target2, max_block_bytes=4096)
    jax.block_until_ready(loss2)
    ref2 = _reference(inputs2, target2)
    assert jnp.allclose(loss2, ref2, rtol=1e-5, atol=1e-6), (loss2, ref2)

    print("KERNEL_OK")
</pallas_src>

<mosaic_0001>
module attributes {stable_mosaic.version = 11 : i64} {
  func.func @_focal2way_kernel(%arg0: i32, %arg1: i32, %arg2: memref<2x32xf32, #tpu.memory_space<vmem>>, %arg3: memref<2x32xf32, #tpu.memory_space<vmem>>, %arg4: memref<2x8x32xf32, #tpu.memory_space<vmem>>, %arg5: memref<1x8x128xf32, #tpu.memory_space<vmem>>, %arg6: memref<2x32xf32, #tpu.memory_space<vmem>>, %arg7: memref<2x32xf32, #tpu.memory_space<vmem>>) attributes {dimension_semantics = [#tpu.dimension_semantics<parallel>, #tpu.dimension_semantics<arbitrary>], iteration_bounds = array<i64: 1, 1>, scalar_prefetch = 0 : i64, scratch_operands = 2 : i64, tpu.core_type = #tpu.core_type<tc>, window_params = [{transform_indices = @transform_0, window_bounds = array<i64: 2, 32>}, {transform_indices = @transform_1, window_bounds = array<i64: 2, 32>}, {transform_indices = @transform_2, window_bounds = array<i64: 2, 8, 32>}, {transform_indices = @transform_3, window_bounds = array<i64: 1, 8, 128>}]} {
    %c0 = arith.constant 0 : index
    %c0_0 = arith.constant 0 : index
    %c0_1 = arith.constant 0 : index
    %0 = vector.load %arg4[%c0, %c0_0, %c0_1] : memref<2x8x32xf32, #tpu.memory_space<vmem>>, vector<2x8x32xf32>
    %cst = arith.constant dense<0xFF800000> : vector<2x32xf32>
    %1 = vector.multi_reduction <maximumf>, %0, %cst [1] : vector<2x8x32xf32> to vector<2x32xf32>
    %c0_i32 = arith.constant 0 : i32
    %2 = arith.cmpi eq, %arg1, %c0_i32 : i32
    %3 = arith.extui %2 : i1 to i32
    %c0_i32_2 = arith.constant 0 : i32
    %4 = arith.cmpi ne, %3, %c0_i32_2 : i32
    scf.if %4 {
      %c0_7 = arith.constant 0 : index
      %c0_8 = arith.constant 0 : index
      %11 = vector.load %arg6[%c0_7, %c0_8] : memref<2x32xf32, #tpu.memory_space<vmem>>, vector<2x32xf32>
      tpu.vector_store %arg6[%c0_7, %c0_8], %1 {strides = array<i32>} : memref<2x32xf32, #tpu.memory_space<vmem>>, vector<2x32xf32>,
      %c0_9 = arith.constant 0 : index
      %c0_10 = arith.constant 0 : index
      %12 = vector.load %arg3[%c0_9, %c0_10] : memref<2x32xf32, #tpu.memory_space<vmem>>, vector<2x32xf32>
      %c0_11 = arith.constant 0 : index
      %c0_12 = arith.constant 0 : index
      %13 = vector.load %arg2[%c0_11, %c0_12] : memref<2x32xf32, #tpu.memory_space<vmem>>, vector<2x32xf32>
      %14 = math.absf %13 : vector<2x32xf32>
      %cst_13 = arith.constant 0.000000e+00 : f32
      %15 = vector.broadcast %cst_13 : f32 to vector<2x32xf32>
      %16 = arith.subf %15, %14 : vector<2x32xf32>
      %17 = math.exp %16 : vector<2x32xf32>
      %cst_14 = arith.constant 0.000000e+00 : f32
      %18 = vector.broadcast %cst_14 : f32 to vector<2x32xf32>
      %19 = arith.maximumf %13, %18 : vector<2x32xf32>
      %20 = math.log1p %17 : vector<2x32xf32>
      %21 = arith.addf %19, %20 : vector<2x32xf32>
      %cst_15 = arith.constant 1.000000e+00 : f32
      %22 = vector.broadcast %cst_15 : f32 to vector<2x32xf32>
      %23 = arith.addf %22, %17 : vector<2x32xf32>
      %24 = tpu.reciprocal %23 : vector<2x32xf32> -> vector<2x32xf32>
      %cst_16 = arith.constant 0.000000e+00 : f32
      %25 = vector.broadcast %cst_16 : f32 to vector<2x32xf32>
      %26 = arith.cmpf oge, %13, %25 : vector<2x32xf32>
      %27 = arith.mulf %17, %24 : vector<2x32xf32>
      %28 = arith.select %26, %24, %27 : vector<2x32xi1>, vector<2x32xf32>
      %29 = arith.mulf %12, %13 : vector<2x32xf32>
      %30 = arith.subf %21, %29 : vector<2x32xf32>
      %cst_17 = arith.constant 1.000000e+00 : f32
      %31 = vector.broadcast %cst_17 : f32 to vector<2x32xf32>
      %32 = arith.subf %31, %28 : vector<2x32xf32>
      %33 = arith.mulf %28, %28 : vector<2x32xf32>
      %34 = arith.mulf %32, %32 : vector<2x32xf32>
      %cst_18 = arith.constant 2.500000e-01 : f32
      %35 = vector.broadcast %cst_18 : f32 to vector<2x32xf32>
      %36 = arith.mulf %12, %35 : vector<2x32xf32>
      %37 = arith.mulf %36, %34 : vector<2x32xf32>
      %cst_19 = arith.constant 1.000000e+00 : f32
      %38 = vector.broadcast %cst_19 : f32 to vector<2x32xf32>
      %39 = arith.subf %38, %12 : vector<2x32xf32>
      %40 = arith.mulf %39, %33 : vector<2x32xf32>
      %41 = arith.addf %37, %40 : vector<2x32xf32>
      %42 = arith.mulf %41, %30 : vector<2x32xf32>
      %cst_20 = arith.constant 1.000000e+00 : f32
      %43 = vector.broadcast %cst_20 : f32 to vector<2x32xf32>
      %44 = arith.mulf %43, %42 : vector<2x32xf32>
      %c0_21 = arith.constant 0 : index
      %c0_22 = arith.constant 0 : index
      %45 = vector.load %arg7[%c0_21, %c0_22] : memref<2x32xf32, #tpu.memory_space<vmem>>, vector<2x32xf32>
      tpu.vector_store %arg7[%c0_21, %c0_22], %44 {strides = array<i32>} : memref<2x32xf32, #tpu.memory_space<vmem>>, vector<2x32xf32>,
    } else {
    }
    %c0_i32_3 = arith.constant 0 : i32
    %5 = arith.cmpi sgt, %arg1, %c0_i32_3 : i32
    %6 = arith.extui %5 : i1 to i32
    %c0_i32_4 = arith.constant 0 : i32
    %7 = arith.cmpi ne, %6, %c0_i32_4 : i32
    scf.if %7 {
      %c0_7 = arith.constant 0 : index
      %c0_8 = arith.constant 0 : index
      %11 = vector.load %arg6[%c0_7, %c0_8] : memref<2x32xf32, #tpu.memory_space<vmem>>, vector<2x32xf32>
      %12 = arith.maximumf %11, %1 : vector<2x32xf32>
      %c0_9 = arith.constant 0 : index
      %c0_10 = arith.constant 0 : index
      %13 = vector.load %arg6[%c0_9, %c0_10] : memref<2x32xf32, #tpu.memory_space<vmem>>, vector<2x32xf32>
      tpu.vector_store %arg6[%c0_9, %c0_10], %12 {strides = array<i32>} : memref<2x32xf32, #tpu.memory_space<vmem>>, vector<2x32xf32>,
    } else {
    }
    %c0_i32_5 = arith.constant 0 : i32
    %8 = arith.cmpi eq, %arg1, %c0_i32_5 : i32
    %9 = arith.extui %8 : i1 to i32
    %c0_i32_6 = arith.constant 0 : i32
    %10 = arith.cmpi ne, %9, %c0_i32_6 : i32
    scf.if %10 {
      %c0_7 = arith.constant 0 : index
      %c0_8 = arith.constant 0 : index
      %11 = vector.load %arg3[%c0_7, %c0_8] : memref<2x32xf32, #tpu.memory_space<vmem>>, vector<2x32xf32>
      %c0_9 = arith.constant 0 : index
      %c0_10 = arith.constant 0 : index
      %12 = vector.load %arg6[%c0_9, %c0_10] : memref<2x32xf32, #tpu.memory_space<vmem>>, vector<2x32xf32>
      %13 = math.absf %12 : vector<2x32xf32>
      %cst_11 = arith.constant 0.000000e+00 : f32
      %14 = vector.broadcast %cst_11 : f32 to vector<2x32xf32>
      %15 = arith.subf %14, %13 : vector<2x32xf32>
      %16 = math.exp %15 : vector<2x32xf32>
      %cst_12 = arith.constant 0.000000e+00 : f32
      %17 = vector.broadcast %cst_12 : f32 to vector<2x32xf32>
      %18 = arith.maximumf %12, %17 : vector<2x32xf32>
      %19 = math.log1p %16 : vector<2x32xf32>
      %20 = arith.addf %18, %19 : vector<2x32xf32>
      %cst_13 = arith.constant 1.000000e+00 : f32
      %21 = vector.broadcast %cst_13 : f32 to vector<2x32xf32>
      %22 = arith.addf %21, %16 : vector<2x32xf32>
      %23 = tpu.reciprocal %22 : vector<2x32xf32> -> vector<2x32xf32>
      %cst_14 = arith.constant 0.000000e+00 : f32
      %24 = vector.broadcast %cst_14 : f32 to vector<2x32xf32>
      %25 = arith.cmpf oge, %12, %24 : vector<2x32xf32>
      %26 = arith.mulf %16, %23 : vector<2x32xf32>
      %27 = arith.select %25, %23, %26 : vector<2x32xi1>, vector<2x32xf32>
      %28 = arith.mulf %11, %12 : vector<2x32xf32>
      %29 = arith.subf %20, %28 : vector<2x32xf32>
      %cst_15 = arith.constant 1.000000e+00 : f32
      %30 = vector.broadcast %cst_15 : f32 to vector<2x32xf32>
      %31 = arith.subf %30, %27 : vector<2x32xf32>
      %32 = arith.mulf %27, %27 : vector<2x32xf32>
      %33 = arith.mulf %31, %31 : vector<2x32xf32>
      %cst_16 = arith.constant 2.500000e-01 : f32
      %34 = vector.broadcast %cst_16 : f32 to vector<2x32xf32>
      %35 = arith.mulf %11, %34 : vector<2x32xf32>
      %36 = arith.mulf %35, %33 : vector<2x32xf32>
      %cst_17 = arith.constant 1.000000e+00 : f32
      %37 = vector.broadcast %cst_17 : f32 to vector<2x32xf32>
      %38 = arith.subf %37, %11 : vector<2x32xf32>
      %39 = arith.mulf %38, %32 : vector<2x32xf32>
      %40 = arith.addf %36, %39 : vector<2x32xf32>
      %41 = arith.mulf %40, %29 : vector<2x32xf32>
      %c0_18 = arith.constant 0 : index
      %c0_19 = arith.constant 0 : index
      %42 = vector.load %arg7[%c0_18, %c0_19] : memref<2x32xf32, #tpu.memory_space<vmem>>, vector<2x32xf32>
      %cst_20 = arith.constant 1.000000e+00 : f32
      %43 = vector.broadcast %cst_20 : f32 to vector<2x32xf32>
      %44 = arith.mulf %43, %41 : vector<2x32xf32>
      %45 = arith.addf %42, %44 : vector<2x32xf32>
      %46 = vector.shape_cast %45 : vector<2x32xf32> to vector<1x2x32xf32>
      %cst_21 = arith.constant dense<0.000000e+00> : vector<1xf32>
      %47 = vector.multi_reduction <add>, %46, %cst_21 [1, 2] : vector<1x2x32xf32> to vector<1xf32>
      %48 = vector.shape_cast %47 : vector<1xf32> to vector<1x1x1xf32>
      %49 = vector.extract %48[0, 0, 0] : f32 from vector<1x1x1xf32>
      %50 = vector.broadcast %49 : f32 to vector<1x8x128xf32>
      %c0_22 = arith.constant 0 : index
      %c0_23 = arith.constant 0 : index
      %c0_24 = arith.constant 0 : index
      %51 = vector.load %arg5[%c0_22, %c0_23, %c0_24] : memref<1x8x128xf32, #tpu.memory_space<vmem>>, vector<1x8x128xf32>
      tpu.vector_store %arg5[%c0_22, %c0_23, %c0_24], %50 {strides = array<i32>} : memref<1x8x128xf32, #tpu.memory_space<vmem>>, vector<1x8x128xf32>,
    } else {
    }
    return
  }
  func.func @transform_0(%arg0: i32, %arg1: i32) -> (i32, i32) {
    %c0_i32 = arith.constant 0 : i32
    %c0_i32_0 = arith.constant 0 : i32
    return %arg0, %c0_i32 : i32, i32
  }
  func.func @transform_1(%arg0: i32, %arg1: i32) -> (i32, i32) {
    %c0_i32 = arith.constant 0 : i32
    %c0_i32_0 = arith.constant 0 : i32
    return %arg0, %c0_i32 : i32, i32
  }
  func.func @transform_2(%arg0: i32, %arg1: i32) -> (i32, i32, i32) {
    %c0_i32 = arith.constant 0 : i32
    %c0_i32_0 = arith.constant 0 : i32
    return %arg0, %arg1, %c0_i32 : i32, i32, i32
  }
  func.func @transform_3(%arg0: i32, %arg1: i32) -> (i32, i32, i32) {
    %c0_i32 = arith.constant 0 : i32
    %c0_i32_0 = arith.constant 0 : i32
    %c0_i32_1 = arith.constant 0 : i32
    return %arg0, %c0_i32, %c0_i32_0 : i32, i32, i32
  }
}

</mosaic_0001>

<bundles_post_ra>
// kernel: tpu_custom_call.1
= control target key start
LH: loop header
LB: loop body
LE: loop exit
PB: predicated region body
PF: predicated region fallthrough
CT: control target
= control target key end

     0   :  { %8 = vsyncpa [#allocation5], 0  ;;  %s397_s0 = inlined_call_operand.hbm [shape: f32[2,32], index: 0, kind: input, shape index: {}]   ;;  %s398_s1 = inlined_call_operand.hbm [shape: f32[2,32], index: 1, kind: input, shape index: {}]   ;;  %s399_s2 = inlined_call_operand.hbm [shape: f32[2,8,32], index: 2, kind: input, shape index: {}]   ;;  %s400_s3 = inlined_call_operand.hbm [shape: f32[1,8,128], index: 3, kind: output, shape index: {}]  }
   0x1   :  { %9 = vsyncpa [#allocation8], 0  ;;  %s27_s14 = sshll.u32 %s398_s1, 4  ;;  %s28_s14 = int_to_ptr.hbm [resolvable:$true] %s27_s14 }
   0x2   :  { %10 = vsyncpa [#allocation6], 0  ;;  %s350_s15 = smov [#allocation7]   ;;  %s16_s19 = sshll.u32 %s397_s0, 4  ;;  %s17_s19 = int_to_ptr.hbm [resolvable:$true] %s16_s19 }
   0x3   :  { %s29_s16 = sshll.u32 %s350_s15, 4  ;;  %s351_s20 = smov [#allocation4]   ;;  %s30_s16 = int_to_ptr.vmem [resolvable:$true] %s29_s16 }
   0x4   :  { %32 = dma.hbm_to_vmem [thread:$0]  %s28_s14, 32, %s30_s16, [#allocation8]  }
   0x5   :  { %s18_s21 = sshll.u32 %s351_s20, 4  ;;  %s37_s24 = sshll.u32 %s399_s2, 4  ;;  %s19_s21 = int_to_ptr.vmem [resolvable:$true] %s18_s21  ;;  %s38_s24 = int_to_ptr.hbm [resolvable:$true] %s37_s24 }
   0x6   :  { %21 = dma.hbm_to_vmem [thread:$0]  %s17_s19, 32, %s19_s21, [#allocation5]  }
   0x7   :  { %s352_s1 = smov [#allocation9]   ;;  %s353_s26 = smov 128  }
   0x8   :  { %s39_s25 = sshll.u32 %s352_s1, 4  ;;  %s354_s27 = smov 8   ;;  %s40_s25 = int_to_ptr.vmem [resolvable:$true] %s39_s25 }
   0x9   :  { %45 = dma.hbm_to_vmem [thread:$0]  %s38_s24, 256, %s40_s25, [#allocation8], %s353_s26, %s353_s26, %s354_s27  }
   0xa   :  { %344 = dma.done.wait [#allocation5], 32  }
   0xb   :  { %345 = vsyncadd [#allocation5], 4294967264 }
   0xc   :  { %346 = dma.done.wait [#allocation8], 288  }
   0xd   :  { %347 = vsyncadd [#allocation8], 4294967008  ;;  %vm60_vm0 = vcmask 261120   ;;  %v58_v0 = vld [vmem:[#allocation9] sm:$0xff]  ;;  %v59_v1 = vld [vmem:[#allocation9 + $0x8] sm:$0xff]  ;;  %vm81_vm1 = vcmask 1041409  }
   0xe   :  { %v61_v2 = vsel %vm60_vm0, %v58_v0, -inf  ;;  %v68_v3 = vsel %vm60_vm0, %v59_v1, -inf  ;;  %v87_v4 = vld [vmem:[#allocation4] sm:$0x3]  ;;  %vm84_vm2 = vcmask 254976   ;;  %s355_s0 = smov [#allocation10]  }
   0xf   :  { %v62_v5 = vrot.slane %v61_v2, 4  ;;  %v69_v6 = vrot.slane %v68_v3, 4  ;;  %v88_v7 = vand.u32 2147483647, %v87_v4  ;;  %v86_v41 = vld [vmem:[#allocation7] sm:$0x3] }
  0x10   :  { %v92_v43 = vmax.f32 %v87_v4, 0.0  ;;  %vm118_vm8 = vcmp.ge.f32.partialorder %v87_v4, 0.0  ;;  %v128_v48 = vsub.f32 1.0, %v86_v41  ;;  %v121_v51 = vmul.f32 %v87_v4, %v86_v41  ;;  %s215_s2 = sshll.u32 %s355_s0, 4  ;;  %s217_s30 = sshll.u32 %s400_s3, 4  ;;  %s216_s2 = int_to_ptr.vmem [resolvable:$true] %s215_s2  ;;  %s218_s30 = int_to_ptr.hbm [resolvable:$true] %s217_s30 }
  0x11   :  { %v63_v8 = vmax.f32 %v61_v2, %v62_v5  ;;  %v70_v9 = vmax.f32 %v68_v3, %v69_v6  ;;  %v89_v10 = vsub.f32 0.0, %v88_v7  ;;  %v126_v55 = vmul.f32 0.25, %v86_v41 }
  0x13   :  { %v64_v11 = vrot.slane %v63_v8, 2  ;;  %v71_v12 = vrot.slane %v70_v9, 2  ;;  %v90_v13 = vmul.f32 1.442695, %v89_v10 }
  0x15   :  { %v65_v14 = vmax.f32 %v63_v8, %v64_v11  ;;  %v72_v15 = vmax.f32 %v70_v9, %v71_v12  ;;  %236 = vpow2.f32 %v90_v13  ;;  %v149_v12 = vld [vmem:[#allocation7] sm:$0x3] }
  0x17   :  { %v66_v16 = vrot.slane %v65_v14, 1  ;;  %v73_v17 = vrot.slane %v72_v15, 1 }
  0x19   :  { %v67_v18 = vmax.f32 %v65_v14, %v66_v16  ;;  %v74_v19 = vmax.f32 %v72_v15, %v73_v17 }
  0x1b   :  { %v237_v20 = vpop.eup %236  ;;  %v82_v21 = vsel %vm81_vm1, %v74_v19, %v67_v18  ;;  %v191_v18 = vsub.f32 1.0, %v149_v12 }
  0x1c   :  { %85 = vst.msk [vmem:[#allocation2] sm:$0x3] %vm84_vm2, %v82_v21  ;;  %v93_v22 = vadd.f32 1.0, %v237_v20  ;;  %v96_v23 = vmul.f32 -0.5, %v237_v20  ;;  %v99_v35 = vand.u32 2147483647, %v237_v20 }
  0x1e   :  { %238 = vrcp.f32 %v93_v22  ;;  %v97_v29 = vadd.f32 1.0, %v96_v23  ;;  %vm109_vm3 = vweird.f32 %v93_v22  ;;  %v115_v30 = vand.u32 2147483648, %v93_v22 }
  0x1f   :  { %240 = vlog2.f32 %v93_v22  ;;  %v113_v32 = vand.u32 2147483647, %v93_v22  ;;  %vm100_vm7 = vcmp.lt.f32.partialorder %v99_v35, 0.0004427343 }
  0x20   :  { %v116_v37 = vor.u32 1.1754944e-38, %v115_v30  ;;  %v98_v39 = vmul.f32 %v237_v20, %v97_v29 }
  0x21   :  { %vm114_vm6 = vcmp.eq.f32.partialorder %v113_v32, 8.507059e+37 }
  0x23   :  { %v386_v24 = vld [vmem:[#allocation2] sm:$0x3] }
  0x24   :  { %v151_v25 = vand.u32 2147483647, %v386_v24  ;;  %v239_v26 = vpop.eup %238  ;;  %v155_v14 = vmax.f32 %v386_v24, 0.0  ;;  %vm181_vm14 = vcmp.ge.f32.partialorder %v386_v24, 0.0 }
  0x25   :  { %v105_v27 = vmul.f32 %v239_v26, %v93_v22  ;;  %vm110_vm4 = vweird.f32 %v239_v26  ;;  %v241_v34 = vpop.eup %240 }
  0x26   :  { %v152_v28 = vsub.f32 0.0, %v151_v25  ;;  %vm111_vm5 = vmor %vm109_vm3, %vm110_vm4  ;;  %v95_v38 = vmul.f32 0.6931472, %v241_v34  ;;  %v189_v25 = vmul.f32 0.25, %v149_v12 }
  0x27   :  { %v106_v31 = vsub.f32 1.0, %v105_v27 }
  0x28   :  { %v153_v33 = vmul.f32 1.442695, %v152_v28  ;;  %v101_v46 = vsel %vm100_vm7, %v98_v39, %v95_v38 }
  0x29   :  { %v107_v36 = vmul.f32 %v239_v26, %v106_v31  ;;  %v102_v52 = vadd.f32 %v101_v46, %v92_v43 }
  0x2a   :  { %242 = vpow2.f32 %v153_v33 }
  0x2b   :  { %v108_v40 = vadd.f32 %v239_v26, %v107_v36  ;;  %v122_v58 = vsub.f32 %v102_v52, %v121_v51 }
  0x2d   :  { %v112_v42 = vsel %vm111_vm5, %v239_v26, %v108_v40 }
  0x2e   :  { %v117_v44 = vsel %vm114_vm6, %v116_v37, %v112_v42 }
  0x2f   :  { %v119_v47 = vmul.f32 %v237_v20, %v117_v44  ;;  %v184_v20 = vmul.f32 %v386_v24, %v149_v12 }
  0x30   :  { %v243_v45 = vpop.eup %242 }
  0x31   :  { %v156_v49 = vadd.f32 1.0, %v243_v45  ;;  %v120_v50 = vsel %vm118_vm8, %v117_v44, %v119_v47  ;;  %v159_v60 = vmul.f32 -0.5, %v243_v45  ;;  %v162_v6 = vand.u32 2147483647, %v243_v45 }
  0x32   :  { %v123_v53 = vsub.f32 1.0, %v120_v50  ;;  %v124_v54 = vmul.f32 %v120_v50, %v120_v50 }
  0x33   :  { %244 = vrcp.f32 %v156_v49  ;;  %v160_v1 = vadd.f32 1.0, %v159_v60  ;;  %v178_v2 = vand.u32 2147483648, %v156_v49  ;;  %vm172_vm9 = vweird.f32 %v156_v49 }
  0x34   :  { %v125_v56 = vmul.f32 %v123_v53, %v123_v53  ;;  %v129_v57 = vmul.f32 %v128_v48, %v124_v54  ;;  %246 = vlog2.f32 %v156_v49  ;;  %v176_v4 = vand.u32 2147483647, %v156_v49 }
  0x35   :  { %v179_v8 = vor.u32 1.1754944e-38, %v178_v2  ;;  %v161_v10 = vmul.f32 %v243_v45, %v160_v1  ;;  %vm163_vm13 = vcmp.lt.f32.partialorder %v162_v6, 0.0004427343 }
  0x36   :  { %v127_v59 = vmul.f32 %v126_v55, %v125_v56  ;;  %vm177_vm12 = vcmp.eq.f32.partialorder %v176_v4, 8.507059e+37 }
  0x38   :  { %v130_v61 = vadd.f32 %v129_v57, %v127_v59 }
  0x39   :  { %v245_v62 = vpop.eup %244 }
  0x3a   :  { %v131_v63 = vmul.f32 %v130_v61, %v122_v58  ;;  %v168_v0 = vmul.f32 %v245_v62, %v156_v49  ;;  %vm173_vm10 = vweird.f32 %v245_v62  ;;  %v247_v5 = vpop.eup %246 }
  0x3b   :  { %vm174_vm11 = vmor %vm172_vm9, %vm173_vm10  ;;  %v158_v9 = vmul.f32 0.6931472, %v247_v5 }
  0x3c   :  { %132 = vst.msk [vmem:[#allocation3] sm:$0x3] %vm84_vm2, %v131_v63  ;;  %v169_v3 = vsub.f32 1.0, %v168_v0 }
  0x3d   :  { %v164_v16 = vsel %vm163_vm13, %v161_v10, %v158_v9 }
  0x3e   :  { %v170_v7 = vmul.f32 %v245_v62, %v169_v3  ;;  %v165_v21 = vadd.f32 %v164_v16, %v155_v14 }
  0x40   :  { %v171_v11 = vadd.f32 %v245_v62, %v170_v7  ;;  %v185_v28 = vsub.f32 %v165_v21, %v184_v20 }
  0x42   :  { %v175_v13 = vsel %vm174_vm11, %v245_v62, %v171_v11 }
  0x43   :  { %v180_v15 = vsel %vm177_vm12, %v179_v8, %v175_v13  ;;  %v195_v31 = vld [vmem:[#allocation3] sm:$0x3] }
  0x44   :  { %v182_v17 = vmul.f32 %v243_v45, %v180_v15 }
  0x46   :  { %v183_v19 = vsel %vm181_vm14, %v180_v15, %v182_v17 }
  0x47   :  { %v186_v22 = vsub.f32 1.0, %v183_v19  ;;  %v187_v23 = vmul.f32 %v183_v19, %v183_v19 }
  0x49   :  { %v188_v26 = vmul.f32 %v186_v22, %v186_v22  ;;  %v192_v27 = vmul.f32 %v191_v18, %v187_v23 }
  0x4b   :  { %v190_v29 = vmul.f32 %v189_v25, %v188_v26 }
  0x4d   :  { %v193_v30 = vadd.f32 %v192_v27, %v190_v29 }
  0x4f   :  { %v194_v32 = vmul.f32 %v193_v30, %v185_v28 }
  0x51   :  { %v196_v33 = vadd.f32 %v195_v31, %v194_v32 }
  0x53   :  { %v198_v34 = vsel %vm84_vm2, %v196_v33, 0.0 }
  0x54   :  { %199 = vadd.xlane.f32.xlu0 %v198_v34 }
  0xc7   :  { %v200_v35 = vpop.xlane.xlu0 %199 }
  0xc8   :  { %v201_v36 = vrot.slane %v200_v35, 4 }
  0xca   :  { %v202_v37 = vadd.f32 %v201_v36, %v200_v35 }
  0xcc   :  { %v203_v38 = vrot.slane %v202_v37, 2 }
  0xce   :  { %v204_v24 = vadd.f32 %v203_v38, %v202_v37 }
  0xd0   :  { %v205_v39 = vrot.slane %v204_v24, 1 }
  0xd2   :  { %v206_v40 = vadd.f32 %v205_v39, %v204_v24 }
  0xd4   :  { %228 = vpush %v206_v40 }
 0x105   :  { %s229_s4 = spop %228 }
 0x106   :  { %v208_v41 = vstv %s229_s4 }
 0x107   :  { %209 = vst [vmem:[#allocation10] sm:$0xff] %v208_v41 }
 0x108   :  { %220 = dma.vmem_to_hbm [thread:$0]  %s216_s2, 128, %s218_s30, [#allocation6]  }
 0x109   :  { %348 = dma.done.wait [#allocation6], 128  }
 0x10a   :  { %349 = vsyncadd [#allocation6], 4294967168 }
 0x10b   :  { %225 = vsyncpa [#allocation5], 1 }
 0x10c   :  { %226 = vsyncpa [#allocation8], 1 }
 0x10d   :  { %227 = vsyncpa [#allocation6], 1 }

</bundles_post_ra>
